<compile_context>
chip_gen: v7x
topology: tpu7x:2x2x1
jax: 0.10.0
libtpu: 0.0.40
codegen_flags: <defaults>
</compile_context>

<pallas_src>
import jax
import jax.numpy as jnp
from jax import lax
from jax.experimental import pallas as pl
from jax.experimental.pallas import tpu as pltpu


def _pick_block_b():
    # v6e: 256-row tiles match the 256-wide MXU.  v5e: 128 matches the MXU
    # M-dim and halves the f32 hidden live-set.  v7x: 128 gives each of the
    # two TensorCores >= 2 grid steps once B >= 256 so prefetch is hidden.
    try:
        kind = jax.devices()[0].device_kind.lower()
    except Exception:  # pragma: no cover - backend not initialized
        return 128
    return 256 if "v6" in kind else 128


_BLOCK_B = _pick_block_b()


def _critic_kernel(s_ref, a_ref, wsT_ref, waT_ref, bs_ref, ba_ref,
                   w2s_ref, w2a_ref, b2_ref, out_ref):
    """One batch tile of the critic forward pass."""
    # Branch Linears straight off the raw inputs (f32 MXU matmul, f32 bias+relu).
    hs = jnp.dot(s_ref[...], wsT_ref[...], preferred_element_type=jnp.float32)
    hs = jnp.maximum(hs + bs_ref[...], 0.0)                      # [bb, H]
    ha = jnp.dot(a_ref[...], waT_ref[...], preferred_element_type=jnp.float32)
    ha = jnp.maximum(ha + ba_ref[...], 0.0)                      # [bb, H]

    # fc2 (out_features == 1) with the batch on lanes:
    #   row = w2_s @ hs^T + w2_a @ ha^T + b2   ->  [1, bb]  (lane-dense store)
    dn = (((1,), (1,)), ((), ()))            # contract last dim of both operands
    row = lax.dot_general(w2s_ref[...], hs, dn,
                          preferred_element_type=jnp.float32)
    row = row + lax.dot_general(w2a_ref[...], ha, dn,
                                preferred_element_type=jnp.float32)
    out_ref[...] = (row + b2_ref[0]).astype(out_ref.dtype)


def prepare_critic_params(params):
    """One-time parameter prep (hoisted out of the per-call path).

    `params` is in PyTorch layout: weight [out_features, in_features], bias [out].
    """
    H = params["w_state"].shape[0]
    f32 = jnp.float32
    return {
        "wsT": params["w_state"].T.astype(f32),                 # [Ds, H]
        "waT": params["w_action"].T.astype(f32),                # [Da, H]
        "bs":  params["b_state"].reshape(1, H).astype(f32),     # [1, H]
        "ba":  params["b_action"].reshape(1, H).astype(f32),    # [1, H]
        "w2s": params["w2"][:, :H].reshape(1, H).astype(f32),   # [1, H]
        "w2a": params["w2"][:, H:].reshape(1, H).astype(f32),   # [1, H]
        "b2":  params["b2"].reshape(1).astype(f32),             # (1,) SMEM scalar
    }


@jax.jit
def critic_forward(state, action, prepped):
    """Returns value [B, 1]."""
    B, Ds = state.shape
    Da = action.shape[1]
    H = prepped["wsT"].shape[1]

    # Batch tiling: single full-extent block for small batches, otherwise
    # cdiv tiling with zero-padded (and later discarded) tail rows.
    if B <= _BLOCK_B:
        block_b, nb, bpad = B, 1, B
    else:
        block_b = _BLOCK_B
        nb = pl.cdiv(B, block_b)
        bpad = nb * block_b
    if bpad != B:
        state = jnp.pad(state, ((0, bpad - B), (0, 0)))
        action = jnp.pad(action, ((0, bpad - B), (0, 0)))

    flops = 2 * bpad * H * (Ds + Da + 2)
    bytes_accessed = 4 * (bpad * (Ds + Da + 1) + H * (Ds + Da + 4) + 1)

    out = pl.pallas_call(
        _critic_kernel,
        out_shape=jax.ShapeDtypeStruct((nb, block_b), jnp.float32),
        grid=(nb,),
        in_specs=[
            pl.BlockSpec((block_b, Ds), lambda i: (i, 0)),          # state tile
            pl.BlockSpec((block_b, Da), lambda i: (i, 0)),          # action tile
            pl.BlockSpec((Ds, H), lambda i: (0, 0)),                # Ws^T (resident)
            pl.BlockSpec((Da, H), lambda i: (0, 0)),                # Wa^T (resident)
            pl.BlockSpec((1, H), lambda i: (0, 0)),                 # b_state
            pl.BlockSpec((1, H), lambda i: (0, 0)),                 # b_action
            pl.BlockSpec((1, H), lambda i: (0, 0)),                 # w2[:, :H]
            pl.BlockSpec((1, H), lambda i: (0, 0)),                 # w2[:, H:]
            pl.BlockSpec(memory_space=pltpu.MemorySpace.SMEM),      # b2 scalar
        ],
        out_specs=pl.BlockSpec((1, block_b), lambda i: (i, 0)),     # lane-dense row
        compiler_params=pltpu.CompilerParams(
            dimension_semantics=("parallel",)),                    # v7x megacore
        cost_estimate=pl.CostEstimate(flops=flops, transcendentals=0,
                                      bytes_accessed=bytes_accessed),
    )(state, action,
      prepped["wsT"], prepped["waT"], prepped["bs"], prepped["ba"],
      prepped["w2s"], prepped["w2a"], prepped["b2"])

    # Layout plumbing only: (nb, block_b) row-major is already batch order.
    return out.reshape(bpad, 1)[:B]


def _ref_forward(state, action, params):
    xs = jax.nn.relu(state @ params["w_state"].T + params["b_state"])
    xa = jax.nn.relu(action @ params["w_action"].T + params["b_action"])
    x = jnp.concatenate([xs, xa], axis=-1)
    return x @ params["w2"].T + params["b2"]


if __name__ == "__main__":
    key = jax.random.PRNGKey(0)
    B, state_dim, action_dim, hidden_dim = 8, 16, 8, 128

    k = jax.random.split(key, 8)
    params = {
        "w_state":  0.1 * jax.random.normal(k[0], (hidden_dim, state_dim), jnp.float32),
        "b_state":  0.1 * jax.random.normal(k[1], (hidden_dim,), jnp.float32),
        "w_action": 0.1 * jax.random.normal(k[2], (hidden_dim, action_dim), jnp.float32),
        "b_action": 0.1 * jax.random.normal(k[3], (hidden_dim,), jnp.float32),
        "w2":       0.1 * jax.random.normal(k[4], (1, hidden_dim * 2), jnp.float32),
        "b2":       0.1 * jax.random.normal(k[5], (1,), jnp.float32),
    }
    state = jax.random.normal(k[6], (B, state_dim), jnp.float32)
    action = jax.random.normal(k[7], (B, action_dim), jnp.float32)

    # One-time parameter prep (hoisted out of the per-call path).
    prepped = prepare_critic_params(params)

    # Small-batch path: single full-extent block.
    value = jax.block_until_ready(critic_forward(state, action, prepped))
    ref = _ref_forward(state, action, params)
    assert value.shape == (B, 1)
    assert jnp.allclose(value, ref, atol=2e-2, rtol=2e-2)

    # Tiled + padded path: batch not divisible by the block size (exercises
    # cdiv grid, zero-padded tail, lane-dense per-block stores).
    Bb = 300
    kb = jax.random.split(jax.random.PRNGKey(1), 2)
    state_big = jax.random.normal(kb[0], (Bb, state_dim), jnp.float32)
    action_big = jax.random.normal(kb[1], (Bb, action_dim), jnp.float32)
    value_big = jax.block_until_ready(critic_forward(state_big, action_big, prepped))
    ref_big = _ref_forward(state_big, action_big, params)
    assert value_big.shape == (Bb, 1)
    assert jnp.allclose(value_big, ref_big, atol=2e-2, rtol=2e-2)

    print("KERNEL_OK")
</pallas_src>

<mosaic_0001>
module attributes {stable_mosaic.version = 11 : i64} {
  func.func @_critic_kernel(%arg0: i32, %arg1: memref<8x16xf32, #tpu.memory_space<vmem>>, %arg2: memref<8x8xf32, #tpu.memory_space<vmem>>, %arg3: memref<16x128xf32, #tpu.memory_space<vmem>>, %arg4: memref<8x128xf32, #tpu.memory_space<vmem>>, %arg5: memref<1x128xf32, #tpu.memory_space<vmem>>, %arg6: memref<1x128xf32, #tpu.memory_space<vmem>>, %arg7: memref<1x128xf32, #tpu.memory_space<vmem>>, %arg8: memref<1x128xf32, #tpu.memory_space<vmem>>, %arg9: memref<1xf32, #tpu.memory_space<smem>>, %arg10: memref<1x8xf32, #tpu.memory_space<vmem>>) attributes {dimension_semantics = [#tpu.dimension_semantics<parallel>], iteration_bounds = array<i64: 1>, scalar_prefetch = 0 : i64, scratch_operands = 0 : i64, tpu.core_type = #tpu.core_type<tc>, window_params = [{transform_indices = @transform_0, window_bounds = array<i64: 8, 16>}, {transform_indices = @transform_1, window_bounds = array<i64: 8, 8>}, {pipeline_mode = #tpu.pipeline_mode<synchronous>, transform_indices = @transform_2, window_bounds = array<i64: 16, 128>}, {pipeline_mode = #tpu.pipeline_mode<synchronous>, transform_indices = @transform_3, window_bounds = array<i64: 8, 128>}, {pipeline_mode = #tpu.pipeline_mode<synchronous>, transform_indices = @transform_4, window_bounds = array<i64: 1, 128>}, {pipeline_mode = #tpu.pipeline_mode<synchronous>, transform_indices = @transform_5, window_bounds = array<i64: 1, 128>}, {pipeline_mode = #tpu.pipeline_mode<synchronous>, transform_indices = @transform_6, window_bounds = array<i64: 1, 128>}, {pipeline_mode = #tpu.pipeline_mode<synchronous>, transform_indices = @transform_7, window_bounds = array<i64: 1, 128>}, {transform_indices = @transform_8, window_bounds = array<i64: 1>}, {transform_indices = @transform_9, window_bounds = array<i64: 1, 8>}]} {
    %c0 = arith.constant 0 : index
    %c0_0 = arith.constant 0 : index
    %0 = vector.load %arg1[%c0, %c0_0] : memref<8x16xf32, #tpu.memory_space<vmem>>, vector<8x16xf32>
    %c0_1 = arith.constant 0 : index
    %c0_2 = arith.constant 0 : index
    %1 = vector.load %arg3[%c0_1, %c0_2] : memref<16x128xf32, #tpu.memory_space<vmem>>, vector<16x128xf32>
    %cst = arith.constant dense<0.000000e+00> : vector<8x128xf32>
    %2 = tpu.matmul %0, %1, %cst {dimension_numbers = #tpu.dot_dimension_numbers<[1], [0], [0], [1], [0, 0, 1, 1], [], []>} : vector<8x16xf32>, vector<16x128xf32>, vector<8x128xf32> -> vector<8x128xf32>
    %c0_3 = arith.constant 0 : index
    %c0_4 = arith.constant 0 : index
    %3 = vector.load %arg5[%c0_3, %c0_4] : memref<1x128xf32, #tpu.memory_space<vmem>>, vector<1x128xf32>
    %4 = vector.broadcast %3 : vector<1x128xf32> to vector<8x128xf32>
    %5 = arith.addf %2, %4 : vector<8x128xf32>
    %cst_5 = arith.constant 0.000000e+00 : f32
    %6 = vector.broadcast %cst_5 : f32 to vector<8x128xf32>
    %7 = arith.maximumf %5, %6 : vector<8x128xf32>
    %c0_6 = arith.constant 0 : index
    %c0_7 = arith.constant 0 : index
    %8 = vector.load %arg2[%c0_6, %c0_7] : memref<8x8xf32, #tpu.memory_space<vmem>>, vector<8x8xf32>
    %c0_8 = arith.constant 0 : index
    %c0_9 = arith.constant 0 : index
    %9 = vector.load %arg4[%c0_8, %c0_9] : memref<8x128xf32, #tpu.memory_space<vmem>>, vector<8x128xf32>
    %cst_10 = arith.constant dense<0.000000e+00> : vector<8x128xf32>
    %10 = tpu.matmul %8, %9, %cst_10 {dimension_numbers = #tpu.dot_dimension_numbers<[1], [0], [0], [1], [0, 0, 1, 1], [], []>} : vector<8x8xf32>, vector<8x128xf32>, vector<8x128xf32> -> vector<8x128xf32>
    %c0_11 = arith.constant 0 : index
    %c0_12 = arith.constant 0 : index
    %11 = vector.load %arg6[%c0_11, %c0_12] : memref<1x128xf32, #tpu.memory_space<vmem>>, vector<1x128xf32>
    %12 = vector.broadcast %11 : vector<1x128xf32> to vector<8x128xf32>
    %13 = arith.addf %10, %12 : vector<8x128xf32>
    %cst_13 = arith.constant 0.000000e+00 : f32
    %14 = vector.broadcast %cst_13 : f32 to vector<8x128xf32>
    %15 = arith.maximumf %13, %14 : vector<8x128xf32>
    %c0_14 = arith.constant 0 : index
    %c0_15 = arith.constant 0 : index
    %16 = vector.load %arg7[%c0_14, %c0_15] : memref<1x128xf32, #tpu.memory_space<vmem>>, vector<1x128xf32>
    %cst_16 = arith.constant dense<0.000000e+00> : vector<1x8xf32>
    %17 = tpu.matmul %16, %7, %cst_16 {dimension_numbers = #tpu.dot_dimension_numbers<[1], [1], [0], [0], [0, 0, 1, 0], [], []>} : vector<1x128xf32>, vector<8x128xf32>, vector<1x8xf32> -> vector<1x8xf32>
    %c0_17 = arith.constant 0 : index
    %c0_18 = arith.constant 0 : index
    %18 = vector.load %arg8[%c0_17, %c0_18] : memref<1x128xf32, #tpu.memory_space<vmem>>, vector<1x128xf32>
    %cst_19 = arith.constant dense<0.000000e+00> : vector<1x8xf32>
    %19 = tpu.matmul %18, %15, %cst_19 {dimension_numbers = #tpu.dot_dimension_numbers<[1], [1], [0], [0], [0, 0, 1, 0], [], []>} : vector<1x128xf32>, vector<8x128xf32>, vector<1x8xf32> -> vector<1x8xf32>
    %20 = arith.addf %17, %19 : vector<1x8xf32>
    %c0_20 = arith.constant 0 : index
    %21 = memref.load %arg9[%c0_20] : memref<1xf32, #tpu.memory_space<smem>>
    %22 = vector.broadcast %21 : f32 to vector<1x8xf32>
    %23 = arith.addf %20, %22 : vector<1x8xf32>
    %c0_21 = arith.constant 0 : index
    %c0_22 = arith.constant 0 : index
    %24 = vector.load %arg10[%c0_21, %c0_22] : memref<1x8xf32, #tpu.memory_space<vmem>>, vector<1x8xf32>
    tpu.vector_store %arg10[%c0_21, %c0_22], %23 {strides = array<i32>} : memref<1x8xf32, #tpu.memory_space<vmem>>, vector<1x8xf32>,
    return
  }
  func.func @transform_0(%arg0: i32) -> (i32, i32) {
    %c0_i32 = arith.constant 0 : i32
    %c0_i32_0 = arith.constant 0 : i32
    return %arg0, %c0_i32 : i32, i32
  }
  func.func @transform_1(%arg0: i32) -> (i32, i32) {
    %c0_i32 = arith.constant 0 : i32
    %c0_i32_0 = arith.constant 0 : i32
    return %arg0, %c0_i32 : i32, i32
  }
  func.func @transform_2(%arg0: i32) -> (i32, i32) {
    %c0_i32 = arith.constant 0 : i32
    %c0_i32_0 = arith.constant 0 : i32
    %c0_i32_1 = arith.constant 0 : i32
    return %c0_i32, %c0_i32_0 : i32, i32
  }
  func.func @transform_3(%arg0: i32) -> (i32, i32) {
    %c0_i32 = arith.constant 0 : i32
    %c0_i32_0 = arith.constant 0 : i32
    %c0_i32_1 = arith.constant 0 : i32
    return %c0_i32, %c0_i32_0 : i32, i32
  }
  func.func @transform_4(%arg0: i32) -> (i32, i32) {
    %c0_i32 = arith.constant 0 : i32
    %c0_i32_0 = arith.constant 0 : i32
    %c0_i32_1 = arith.constant 0 : i32
    return %c0_i32, %c0_i32_0 : i32, i32
  }
  func.func @transform_5(%arg0: i32) -> (i32, i32) {
    %c0_i32 = arith.constant 0 : i32
    %c0_i32_0 = arith.constant 0 : i32
    %c0_i32_1 = arith.constant 0 : i32
    return %c0_i32, %c0_i32_0 : i32, i32
  }
  func.func @transform_6(%arg0: i32) -> (i32, i32) {
    %c0_i32 = arith.constant 0 : i32
    %c0_i32_0 = arith.constant 0 : i32
    %c0_i32_1 = arith.constant 0 : i32
    return %c0_i32, %c0_i32_0 : i32, i32
  }
  func.func @transform_7(%arg0: i32) -> (i32, i32) {
    %c0_i32 = arith.constant 0 : i32
    %c0_i32_0 = arith.constant 0 : i32
    %c0_i32_1 = arith.constant 0 : i32
    return %c0_i32, %c0_i32_0 : i32, i32
  }
  func.func @transform_8(%arg0: i32) -> i32 {
    %c0_i32 = arith.constant 0 : i32
    %c0_i32_0 = arith.constant 0 : i32
    return %c0_i32 : i32
  }
  func.func @transform_9(%arg0: i32) -> (i32, i32) {
    %c0_i32 = arith.constant 0 : i32
    %c0_i32_0 = arith.constant 0 : i32
    return %arg0, %c0_i32 : i32, i32
  }
}

</mosaic_0001>

<bundles_post_ra>
// kernel: critic_forward.1
= control target key start
LH: loop header
LB: loop body
LE: loop exit
PB: predicated region body
PF: predicated region fallthrough
CT: control target
= control target key end

     0   :  { %15 = vsyncpa [#allocation4], 0  ;;  %s626_s0 = inlined_call_operand.hbm [shape: f32[8,16], index: 0, kind: input, shape index: {}]   ;;  %s627_s1 = inlined_call_operand.hbm [shape: f32[8,8], index: 1, kind: input, shape index: {}]   ;;  %s628_s2 = inlined_call_operand.vmem [shape: f32[16,128], index: 2, kind: input, shape index: {}]   ;;  %s629_s3 = inlined_call_operand.vmem [shape: f32[8,128], index: 3, kind: input, shape index: {}]   ;;  %s630_s4 = inlined_call_operand.vmem [shape: f32[1,128], index: 4, kind: input, shape index: {}]   ;;  %s631_s5 = inlined_call_operand.vmem [shape: f32[1,128], index: 5, kind: input, shape index: {}]   ;;  %s632_s6 = inlined_call_operand.vmem [shape: f32[1,128], index: 6, kind: input, shape index: {}]   ;;  %s633_s7 = inlined_call_operand.vmem [shape: f32[1,128], index: 7, kind: input, shape index: {}]   ;;  %s634_s8 = inlined_call_operand.<no memory space> [shape: f32[1], index: 8, kind: input, shape index: {}]   ;;  %s635_s9 = inlined_call_operand.hbm [shape: f32[1,8], index: 9, kind: output, shape index: {}]  }
   0x1   :  { %16 = vsyncpa [#allocation7], 0 }
   0x2   :  { %17 = vsyncpa [#allocation5], 0  ;;  %s506_s30 = smov [#allocation3]   ;;  %s507_s11 = smov [#allocation6]  }
   0x3   :  { %s24_s10 = sshll.u32 %s506_s30, 4  ;;  %s34_s12 = sshll.u32 %s507_s11, 4  ;;  %s25_s10 = int_to_ptr.vmem [resolvable:$true] %s24_s10  ;;  %s35_s12 = int_to_ptr.vmem [resolvable:$true] %s34_s12 }
   0x4   :  { %s434_s15 = scalar_lea.hbm %s626_s0, 128 }
   0x5   :  { %p435_p0 = scmp.ne.s32.totalorder %s626_s0, %s434_s15  ;;  %p438_p1 = scmp.lt.u32.totalorder %s434_s15, %s626_s0 }
   0x7   :  { %p440_p2 = pnand %p438_p1, %p435_p0 }
   0x9   :  { %443 = shalt.err (!%p440_p2)
}
   0xa   :  { %s444_s20 = scalar_lea.vmem %s25_s10, 128  ;;  %p449_p4 = scmp.lt.s32.totalorder %s25_s10, %s25_s10 }
   0xb   :  { %p445_p3 = scmp.ne.s32.totalorder %s25_s10, %s444_s20  ;;  %p450_p5 = scmp.lt.s32.totalorder %s444_s20, %s444_s20 }
   0xd   :  { %p451_p6 = por %p450_p5, %p449_p4 }
   0xf   :  { %p452_p7 = pnand %p451_p6, %p445_p3 }
  0x11   :  { %455 = shalt.err (!%p452_p7)
}
  0x12   :  { %27 = dma.hbm_to_vmem [thread:$0]  %s626_s0, 128, %s25_s10, [#allocation4]  }
  0x13   :  { %s456_s25 = scalar_lea.hbm %s627_s1, 128 }
  0x14   :  { %p457_p8 = scmp.ne.s32.totalorder %s627_s1, %s456_s25  ;;  %p460_p9 = scmp.lt.u32.totalorder %s456_s25, %s627_s1 }
  0x16   :  { %p462_p10 = pnand %p460_p9, %p457_p8 }
  0x18   :  { %465 = shalt.err (!%p462_p10)
}
  0x19   :  { %s466_s30 = scalar_lea.vmem %s35_s12, 128  ;;  %p471_p12 = scmp.lt.s32.totalorder %s35_s12, %s35_s12 }
  0x1a   :  { %p467_p11 = scmp.ne.s32.totalorder %s35_s12, %s466_s30  ;;  %p472_p13 = scmp.lt.s32.totalorder %s466_s30, %s466_s30 }
  0x1c   :  { %p473_p0 = por %p472_p13, %p471_p12 }
  0x1e   :  { %p474_p1 = pnand %p473_p0, %p467_p11 }
  0x20   :  { %477 = shalt.err (!%p474_p1)
}
  0x21   :  { %37 = dma.hbm_to_vmem [thread:$0]  %s627_s1, 128, %s35_s12, [#allocation7]  }
  0x22   :  { %500 = dma.done.wait [#allocation4], 128  }
  0x23   :  { %501 = vsyncadd [#allocation4], 4294967168 }
  0x24   :  { %502 = dma.done.wait [#allocation7], 128  }
  0x25   :  { %503 = vsyncadd [#allocation7], 4294967168  ;;  %v508_v0 = vmov 0.0|0.0   ;;  %v509_v1 = vmov 0.0   ;;  %vm510_vm0 = vmmov 0   ;;  %vm152_vm1 = vcmask 64512  }
  0x26   :  { %425 = vmatprep.subr.bf16.mxu0 %v508_v0  ;;  %410 = vmatprep.subr.mxu1 %v509_v1  ;;  %v59_v2 = vld [vmem:[%s628_s2] sm:$0xff]  ;;  %v60_v3 = vld [vmem:[%s628_s2 + $0x8] sm:$0xff]  ;;  %vm68_vm2 = vcmask 130048   ;;  %v370_v23 = vstv %s634_s8  ;;  %s511_s22 = smov [#allocation8]   ;;  %vm372_vm3 = vcmask 57344  }
  0x27   :  { %412 = vmatprep.mubr.msk.f32.mxu1 %vm510_vm0, %v509_v1  ;;  %407 = vmatprep.mubr.msk.f32.mxu0 %vm510_vm0, %v509_v1  ;;  %v144_v4 = vld [vmem:[%s629_s3] sm:$0xff]  ;;  %v426_v5 = vpack.c.bf16 %v60_v3, %v59_v2  ;;  %v143_v6 = vld [vmem:[#allocation6] sm:$0xff]  ;;  %s380_s23 = sshll.u32 %s511_s22, 4  ;;  %s381_s23 = int_to_ptr.vmem [resolvable:$true] %s380_s23 }
  0x28   :  { %411 = vmatpush3.msra.mxu1 %v144_v4  ;;  %v58_v7 = vld [vmem:[#allocation3] sm:$0xff]  ;;  %s482_s24 = scalar_lea.vmem %s381_s23, 32  ;;  %p483_p3 = scmp.lt.s32.totalorder %s381_s23, %s381_s23 }
  0x29   :  { %413 = vmatmul.mubr.msk.f32.vlgmr.msra.gmra.mrb[0].mxu1 %vm152_vm1, %v143_v6  ;;  %415 = vmatprep.subr.mxu1 %v509_v1  ;;  %v392_v8 = vld [vmem:[%s631_s5] ss:$0 sm:$0xff] }
  0x2a   :  { %427 = vmatpush3.bf16.msra.mxu0 %v426_v5  ;;  %417 = vmatprep.mubr.msk.f32.mxu1 %vm510_vm0, %v509_v1  ;;  %v390_v12 = vld [vmem:[%s630_s4] ss:$0 sm:$0xff] }
  0x2b   :  { %420 = vmatprep.subr.mxu0 %v509_v1  ;;  %v228_v17 = vld [vmem:[%s633_s7] sm:$0x1]  ;;  %s478_s7 = scalar_lea.vmem %s381_s23, 16 }
  0x2c   :  { %v227_v19 = vld [vmem:[%s632_s6] sm:$0x1]  ;;  %p479_p2 = scmp.ne.s32.totalorder %s381_s23, %s478_s7  ;;  %p484_p4 = scmp.lt.s32.totalorder %s482_s24, %s478_s7 }
  0x2d   :  { %408 = vmatmul.mubr.msk.f32.vlgmr.msra.gmra.mrb[0].mxu0 %vm68_vm2, %v58_v7 }
  0x2e   :  { %422 = vmatprep.mubr.msk.f32.mxu0 %vm510_vm0, %v509_v1  ;;  %p485_p5 = por %p484_p4, %p483_p3 }
  0x30   :  { %p486_p6 = pnand %p485_p5, %p479_p2 }
  0xfc   :  { %v222_v9 = vpop.f32.mrb[0].mxu1 }
  0xfd   :  { %v223_v10 = vadd.f32 %v392_v8, %v222_v9  ;;  %v414_v11 = vpop.f32.mrb[1].mxu1 }
  0xff   :  { %v226_v13 = vmax.f32 %v223_v10, 0.0 }
 0x100   :  { %v138_v14 = vpop.f32.mrb[0].mxu0 }
 0x101   :  { %v139_v15 = vadd.f32 %v390_v12, %v138_v14  ;;  %v409_v16 = vpop.f32.mrb[1].mxu0  ;;  %416 = vmatpush3.xpose.msra.mxu1 %v226_v13 }
 0x103   :  { %v142_v18 = vmax.f32 %v139_v15, 0.0 }
 0x104   :  { %418 = vmatmul.mubr.f32.vlgmr.msra.gmra.mrb[2].mxu1 %v228_v17 }
 0x105   :  { %421 = vmatpush3.xpose.msra.mxu0 %v142_v18 }
 0x108   :  { %423 = vmatmul.mubr.f32.vlgmr.msra.gmra.mrb[2].mxu0 %v227_v19 }
 0x1d7   :  { %v295_v20 = vpop.f32.mrb[2].mxu1 }
 0x1d8   :  { %v419_v21 = vpop.f32.mrb[3].mxu1 }
 0x1db   :  { %v365_v22 = vpop.f32.mrb[2].mxu0 }
 0x1dc   :  { %v366_v24 = vadd.f32 %v365_v22, %v295_v20  ;;  %v424_v25 = vpop.f32.mrb[3].mxu0 }
 0x1de   :  { %v371_v26 = vadd.f32 %v370_v23, %v366_v24 }
 0x1e0   :  { %373 = vst.msk [vmem:[#allocation8] sm:$0x1] %vm372_vm3, %v371_v26 }
 0x1e1   :  { %489 = shalt.err (!%p486_p6)
}
 0x1e2   :  { %s490_s8 = scalar_lea.hbm %s635_s9, 16 }
 0x1e3   :  { %p491_p7 = scmp.ne.s32.totalorder %s635_s9, %s490_s8  ;;  %p494_p8 = scmp.lt.u32.totalorder %s490_s8, %s635_s9 }
 0x1e5   :  { %p496_p9 = pnand %p494_p8, %p491_p7 }
 0x1e7   :  { %499 = shalt.err (!%p496_p9)
}
 0x1e8   :  { %383 = dma.vmem_to_hbm [thread:$0]  %s381_s23, 16, %s635_s9, [#allocation5]  }
 0x1e9   :  { %504 = dma.done.wait [#allocation5], 16  }
 0x1ea   :  { %505 = vsyncadd [#allocation5], 4294967280 }
 0x1eb   :  { %387 = vsyncpa [#allocation4], 1 }
 0x1ec   :  { %388 = vsyncpa [#allocation7], 1 }
 0x1ed   :  { %389 = vsyncpa [#allocation5], 1 }

</bundles_post_ra>
